<compile_context>
chip_gen: v6e
topology: v6e:2x2x1
jax: 0.10.0
libtpu: 0.0.40
codegen_flags: <defaults>
</compile_context>

<pallas_src>
import functools
import math

import jax
import jax.numpy as jnp
import numpy as np
from jax import lax
from jax.experimental import pallas as pl
from jax.experimental.pallas import tpu as pltpu

_HALF_LOG_2PI = 0.5 * math.log(2.0 * math.pi)


def _softplus(x):
    # log(1 + exp(x)) without overflow for large x
    return jnp.maximum(x, 0.0) + jnp.log1p(jnp.exp(-jnp.abs(x)))


def _vmem_capacity_bytes(default=64 << 20):
    """Detected VMEM capacity; conservative 64 MiB (v7x) fallback."""
    try:
        cap = getattr(pltpu.get_tpu_info(), "vmem_capacity_bytes", None)
        if cap:
            return int(cap)
    except Exception:
        pass
    return default


# ----------------------------------------------------------------------------------
# Fused reparameterized sampling + KL side terms
#   w = mu + softplus(rho) * eps
#   lvposterior += sum log N(w; mu, sigma)   (uses eps directly: -(log sigma + eps^2/2 + c))
#   lprior      += sum log mixture(w)
# ----------------------------------------------------------------------------------
def _sample_stats_body(i, mu, rho, eps, w_ref, lvp_ref, lpr_ref, *,
                       blk_rows, n_valid, p1, p2, ppi):
    sigma = _softplus(rho)
    w = mu + sigma * eps
    w_ref[...] = w

    # Mask out the zero-padded tail of the flattened parameter slab.
    row = lax.broadcasted_iota(jnp.int32, mu.shape, 0)
    lane = lax.broadcasted_iota(jnp.int32, mu.shape, 1)
    flat = (i * blk_rows + row) * 128 + lane
    mask = (flat < n_valid).astype(jnp.float32)

    # log q(w | mu, sigma): eps is exactly (w - mu)/sigma by construction.
    lvp_elem = -(jnp.log(sigma) + 0.5 * eps * eps + _HALF_LOG_2PI)
    # log p(w): centered Gaussian mixture prior.
    lp1 = -(math.log(p1) + _HALF_LOG_2PI) - 0.5 * (w / p1) ** 2
    if ppi >= 1.0:
        lpr_elem = lp1
    elif ppi <= 0.0:
        lpr_elem = -(math.log(p2) + _HALF_LOG_2PI) - 0.5 * (w / p2) ** 2
    else:
        lp2 = -(math.log(p2) + _HALF_LOG_2PI) - 0.5 * (w / p2) ** 2
        lpr_elem = jnp.logaddexp(math.log(ppi) + lp1, math.log1p(-ppi) + lp2)

    lvp_ref[...] += jnp.sum(mask * lvp_elem, keepdims=True)
    lpr_ref[...] += jnp.sum(mask * lpr_elem, keepdims=True)


def _sample_kernel_prng(seed_ref, mu_ref, rho_ref, w_ref, lvp_ref, lpr_ref, **kw):
    i = pl.program_id(0)

    @pl.when(i == 0)
    def _():
        lvp_ref[...] = jnp.zeros_like(lvp_ref)
        lpr_ref[...] = jnp.zeros_like(lpr_ref)

    # Per-block seed (seed + program_id) so blocks draw independent eps.
    pltpu.prng_seed(seed_ref[0] + i)
    eps = pltpu.stateful_normal(mu_ref.shape, jnp.float32)
    _sample_stats_body(i, mu_ref[...], rho_ref[...], eps, w_ref, lvp_ref, lpr_ref, **kw)


def _sample_kernel_eps(mu_ref, rho_ref, eps_ref, w_ref, lvp_ref, lpr_ref, **kw):
    i = pl.program_id(0)

    @pl.when(i == 0)
    def _():
        lvp_ref[...] = jnp.zeros_like(lvp_ref)
        lpr_ref[...] = jnp.zeros_like(lpr_ref)

    _sample_stats_body(i, mu_ref[...], rho_ref[...], eps_ref[...],
                       w_ref, lvp_ref, lpr_ref, **kw)


def sample_gaussian_params(mus, rhos, key, *, prior_sigma_1, prior_sigma_2, prior_pi,
                           use_onchip_prng=True, block_rows=256):
    """Sample every (mu, rho) pair and accumulate lvposterior / lprior in one kernel.

    All tensors are flattened into a single lane-dense (rows, 128) slab, tiled into
    (block_rows, 128) blocks.  Returns ([samples like mus], lvposterior, lprior).
    """
    shapes = [tuple(m.shape) for m in mus]
    sizes = [int(np.prod(s)) for s in shapes]
    L = int(sum(sizes))
    mu_flat = jnp.concatenate([m.reshape(-1).astype(jnp.float32) for m in mus])
    rho_flat = jnp.concatenate([r.reshape(-1).astype(jnp.float32) for r in rhos])

    rows = -(-L // 128)
    rows = ((rows + 7) // 8) * 8
    tb = max(8, min(int(block_rows), rows))
    tb = ((tb + 7) // 8) * 8
    n_blocks = -(-rows // tb)
    rows_p = n_blocks * tb
    lp = rows_p * 128

    # rho padded with 0 keeps softplus/log finite in the (masked-out) tail.
    mu2 = jnp.pad(mu_flat, (0, lp - L)).reshape(rows_p, 128)
    rho2 = jnp.pad(rho_flat, (0, lp - L)).reshape(rows_p, 128)

    out_shape = (jax.ShapeDtypeStruct((rows_p, 128), jnp.float32),
                 jax.ShapeDtypeStruct((1, 1), jnp.float32),
                 jax.ShapeDtypeStruct((1, 1), jnp.float32))
    stat_kw = dict(blk_rows=tb, n_valid=L, p1=float(prior_sigma_1),
                   p2=float(prior_sigma_2), ppi=float(prior_pi))
    cparams = pltpu.CompilerParams(dimension_semantics=("arbitrary",))

    w2 = lvp = lpr = None
    if use_onchip_prng and hasattr(pltpu, "prng_seed") and hasattr(pltpu, "stateful_normal"):
        try:
            seed = jax.random.randint(key, (1,), 0, np.iinfo(np.int32).max, dtype=jnp.int32)
            grid_spec = pltpu.PrefetchScalarGridSpec(
                num_scalar_prefetch=1, grid=(n_blocks,),
                in_specs=[pl.BlockSpec((tb, 128), lambda i, s: (i, 0)),
                          pl.BlockSpec((tb, 128), lambda i, s: (i, 0))],
                out_specs=[pl.BlockSpec((tb, 128), lambda i, s: (i, 0)),
                           pl.BlockSpec((1, 1), lambda i, s: (0, 0)),
                           pl.BlockSpec((1, 1), lambda i, s: (0, 0))])
            w2, lvp, lpr = pl.pallas_call(
                functools.partial(_sample_kernel_prng, **stat_kw),
                out_shape=out_shape, grid_spec=grid_spec,
                compiler_params=cparams)(seed, mu2, rho2)
        except Exception:
            # The call is eager, so lowering failures of the on-chip PRNG path surface
            # here synchronously; fall back to host-generated eps below.
            w2 = None

    if w2 is None:
        eps2 = jax.random.normal(key, (rows_p, 128), jnp.float32)
        grid_spec = pltpu.PrefetchScalarGridSpec(
            num_scalar_prefetch=0, grid=(n_blocks,),
            in_specs=[pl.BlockSpec((tb, 128), lambda i: (i, 0)),
                      pl.BlockSpec((tb, 128), lambda i: (i, 0)),
                      pl.BlockSpec((tb, 128), lambda i: (i, 0))],
            out_specs=[pl.BlockSpec((tb, 128), lambda i: (i, 0)),
                       pl.BlockSpec((1, 1), lambda i: (0, 0)),
                       pl.BlockSpec((1, 1), lambda i: (0, 0))])
        w2, lvp, lpr = pl.pallas_call(
            functools.partial(_sample_kernel_eps, **stat_kw),
            out_shape=out_shape, grid_spec=grid_spec,
            compiler_params=cparams)(mu2, rho2, eps2)

    w_flat = w2.reshape(-1)[:L]
    samples, off = [], 0
    for s, sz in zip(shapes, sizes):
        samples.append(w_flat[off:off + sz].reshape(s))
        off += sz
    return samples, lvp[0, 0], lpr[0, 0]


# ----------------------------------------------------------------------------------
# Conv2d kernel: output row-band tiling, manual double-buffered input band DMA (one
# chain across the whole batch), bf16 im2col matmul with f32 accumulation, true-Cout
# output store.
#   x_hbm : (N, Hp_need, Wp, Cin)    padded input, stays in HBM (pl.ANY)
#   w_ref : (KH*KW*Cin, Cout_pad)    weight (compute dtype), resident
#   b_ref : (1, Cout_pad)            bias (f32), resident
#   o_ref : (1, TH, OW, Cout)        output row band (f32, ragged last band clipped)
#   band_ref : (2, band_h, Wp, Cin)  double-buffered input band scratch
# ----------------------------------------------------------------------------------
def _conv2d_kernel(x_hbm, w_ref, b_ref, o_ref, band_ref, sem_ref, *,
                   KH, KW, TH, OW, Cin, Cout, Cout_pad, sh, sw, dh, dw,
                   band_h, chain, use_taps):
    n = pl.program_id(0)
    t = pl.program_id(1)
    n_t = pl.num_programs(1)

    def start_band(nn, tt, sl):
        pltpu.make_async_copy(
            x_hbm.at[nn, pl.ds(tt * (TH * sh), band_h)],
            band_ref.at[sl],
            sem_ref.at[sl],
        ).start()

    if chain:
        # One DMA chain over the whole (N, n_t) grid: image n+1's first band is
        # prefetched while image n's last band is computed, so only the very first
        # band's latency is exposed.  Requires sequential grid order on both axes.
        g = n * n_t + t
        slot = lax.rem(g, 2)

        @pl.when(g == 0)
        def _():
            start_band(0, 0, 0)

        total = pl.num_programs(0) * n_t

        @pl.when(g + 1 < total)
        def _():
            ng = g + 1
            start_band(ng // n_t, lax.rem(ng, n_t), 1 - slot)
    else:
        # Per-image chain (keeps the batch axis safe to shard across TensorCores).
        slot = lax.rem(t, 2)

        @pl.when(t == 0)
        def _():
            start_band(n, 0, 0)

        @pl.when(t + 1 < n_t)
        def _():
            start_band(n, t + 1, 1 - slot)

    # Wait for this step's band; descriptor reconstructed exactly as it was started.
    pltpu.make_async_copy(
        x_hbm.at[n, pl.ds(t * (TH * sh), band_h)],
        band_ref.at[slot],
        sem_ref.at[slot],
    ).wait()

    x = band_ref[slot]                                   # (band_h, Wp, Cin), compute dtype

    def tap(kh, kw):
        xw = lax.slice(
            x,
            (kh * dh, kw * dw, 0),
            (kh * dh + (TH - 1) * sh + 1, kw * dw + (OW - 1) * sw + 1, Cin),
            (sh, sw, 1))                                 # (TH, OW, Cin)
        return xw.reshape(TH * OW, Cin)

    if use_taps:
        # Large Cin: skip the lane-axis concat / patch materialization; KH*KW lane-dense
        # matmuls accumulating in f32.
        acc = jnp.zeros((TH * OW, Cout_pad), jnp.float32)
        for kh in range(KH):
            for kw in range(KW):
                wk = w_ref[pl.ds((kh * KW + kw) * Cin, Cin), :]
                acc = acc + jnp.dot(tap(kh, kw), wk,
                                    preferred_element_type=jnp.float32)
    else:
        # Small Cin: one fused im2col matmul, K = KH*KW*Cin, bf16 operands end-to-end.
        parts = [tap(kh, kw) for kh in range(KH) for kw in range(KW)]
        patch = jnp.concatenate(parts, axis=-1)          # (TH*OW, KH*KW*Cin)
        acc = jnp.dot(patch, w_ref[...], preferred_element_type=jnp.float32)

    acc = acc + b_ref[...]
    # True-Cout store: only valid output channels are written back to HBM.
    o_ref[...] = acc.reshape(1, TH, OW, Cout_pad)[..., :Cout].astype(o_ref.dtype)


def conv2d_pallas(x_nhwc, w_oihw, bias, *, stride, padding, dilation,
                  row_tile=None, compute_dtype=jnp.bfloat16, parallel_batch=False):
    """conv2d with zeros padding, groups=1.  x_nhwc: (N, H, W, Cin) float32."""
    N, H, W, Cin = x_nhwc.shape
    Cout, Cin_w, KH, KW = w_oihw.shape
    assert Cin_w == Cin  # TODO(synk): groups != 1 not implemented in the kernel.
    sh, sw = stride
    ph, pw = padding
    dh, dw = dilation
    itemsize = jnp.dtype(compute_dtype).itemsize

    Hp, Wp = H + 2 * ph, W + 2 * pw
    OH = (Hp - (dh * (KH - 1) + 1)) // sh + 1
    OW = (Wp - (dw * (KW - 1) + 1)) // sw + 1
    Cout_pad = ((Cout + 127) // 128) * 128
    use_taps = Cin >= 128

    # --- Tile sizing from detected VMEM capacity (64 MiB v7x / 128 MiB v5e, v6e). ---
    vmem_cap = _vmem_capacity_bytes()
    w_bytes = 2 * (KH * KW * Cin * Cout_pad * itemsize + Cout_pad * 4)   # resident x2

    def step_bytes(th):
        bh = (th - 1) * sh + dh * (KH - 1) + 1
        band = 2 * bh * Wp * Cin * itemsize                       # double-buffered band
        if use_taps:
            interm = th * OW * Cin * itemsize                     # one tap slice live
        else:
            interm = 2 * th * OW * KH * KW * Cin * itemsize       # parts + fused patch
        acc = th * OW * Cout_pad * 4
        outb = 2 * th * OW * Cout * 4                             # double-buffered out
        return band + interm + acc + outb

    if row_tile is None:
        budget = max(int(0.45 * vmem_cap) - w_bytes, 1 << 20)
        lo, hi = 1, OH
        while lo < hi:                                            # largest TH in budget
            mid = (lo + hi + 1) // 2
            if step_bytes(mid) <= budget:
                lo = mid
            else:
                hi = mid - 1
        TH = lo
    else:
        TH = max(1, min(int(row_tile), OH))
    n_t = pl.cdiv(OH, TH)                                         # ragged last band OK
    band_h = (TH - 1) * sh + dh * (KH - 1) + 1

    # Zeros padding (padding_mode='zeros'); extra bottom rows keep the ragged last
    # band's DMA in-bounds (its extra output rows are clipped by Pallas at writeback).
    # TODO(synk): fold the halo zero padding into the band DMA (avoid the HBM copy).
    Hp_need = max(Hp, (n_t - 1) * TH * sh + band_h)
    xp = jnp.pad(x_nhwc.astype(compute_dtype),
                 ((0, 0), (ph, ph + (Hp_need - Hp)), (pw, pw), (0, 0)))

    # OIHW -> (KH*KW*Cin, Cout_pad), matching the im2col patch column order.
    w_mat = jnp.transpose(w_oihw, (2, 3, 1, 0)).reshape(KH * KW * Cin, Cout)
    w_mat = jnp.pad(w_mat, ((0, 0), (0, Cout_pad - Cout))).astype(compute_dtype)
    b_pad = jnp.pad(bias.astype(jnp.float32), (0, Cout_pad - Cout)).reshape(1, Cout_pad)

    chain = not parallel_batch
    kernel = functools.partial(
        _conv2d_kernel, KH=KH, KW=KW, TH=TH, OW=OW, Cin=Cin, Cout=Cout,
        Cout_pad=Cout_pad, sh=sh, sw=sw, dh=dh, dw=dw, band_h=band_h,
        chain=chain, use_taps=use_taps)

    need = w_bytes + step_bytes(TH)
    vmem_limit = int(min(0.9 * vmem_cap, max(int(1.5 * need) + (8 << 20), 32 << 20)))

    # "parallel" on the batch axis only helps on multi-TensorCore chips (v7x) and breaks
    # the cross-image DMA chain; the default is one sequential chain over (N, n_t).
    # TODO(synk): explicit megacore row-band split for batch-1 inference on v7x.
    dim_sems = ("parallel", "arbitrary") if parallel_batch else ("arbitrary", "arbitrary")

    out = pl.pallas_call(
        kernel,
        out_shape=jax.ShapeDtypeStruct((N, OH, OW, Cout), jnp.float32),
        grid_spec=pltpu.PrefetchScalarGridSpec(
            num_scalar_prefetch=0,
            grid=(N, n_t),
            in_specs=[
                pl.BlockSpec(memory_space=pl.ANY),                             # x in HBM
                pl.BlockSpec((KH * KW * Cin, Cout_pad), lambda n, t: (0, 0)),  # resident
                pl.BlockSpec((1, Cout_pad), lambda n, t: (0, 0)),              # resident
            ],
            out_specs=pl.BlockSpec((1, TH, OW, Cout), lambda n, t: (n, t, 0, 0)),
            scratch_shapes=[
                pltpu.VMEM((2, band_h, Wp, Cin), compute_dtype),   # band double buffer
                pltpu.SemaphoreType.DMA((2,)),
            ],
        ),
        compiler_params=pltpu.CompilerParams(
            dimension_semantics=dim_sems,
            vmem_limit_bytes=vmem_limit),
    )(xp, w_mat, b_pad)
    return out


# ----------------------------------------------------------------------------------
# BayesConv2d wrapper (parameters initialized like reset_parameters())
# ----------------------------------------------------------------------------------
class BayesConv2dPallas:
    def __init__(self, in_channels, out_channels, kernel_size, stride=1, padding=0,
                 dilation=1, prior_sigma_1=0.1, prior_sigma_2=0.002, prior_pi=1.0,
                 mu_init=0.0, sigma_init=-6.0, frozen=False, bias=True, key=None):
        pair = lambda v: (v, v) if isinstance(v, int) else tuple(v)
        self.in_channels = in_channels
        self.out_channels = out_channels
        self.kernel_size = pair(kernel_size)
        self.stride = pair(stride)
        self.padding = pair(padding)
        self.dilation = pair(dilation)
        self.prior_sigma_1 = prior_sigma_1
        self.prior_sigma_2 = prior_sigma_2
        self.prior_pi = prior_pi
        self.frozen = frozen
        self.has_bias = bias
        # TODO(synk): groups != 1 and padding_mode != 'zeros' not implemented.

        KH, KW = self.kernel_size
        wshape = (out_channels, in_channels, KH, KW)
        k = jax.random.PRNGKey(0) if key is None else key
        k_wmu, k_wrho, k_bmu, k_brho = jax.random.split(k, 4)
        # reset_parameters(): normal(mu_init, 0.1) / normal(sigma_init, 0.1)
        self.weight_mu = mu_init + 0.1 * jax.random.normal(k_wmu, wshape, jnp.float32)
        self.weight_rho = sigma_init + 0.1 * jax.random.normal(k_wrho, wshape, jnp.float32)
        if bias:
            self.bias_mu = mu_init + 0.1 * jax.random.normal(k_bmu, (out_channels,), jnp.float32)
            self.bias_rho = sigma_init + 0.1 * jax.random.normal(k_brho, (out_channels,), jnp.float32)
        else:
            self.bias_mu = None
            self.bias_rho = None
        self.lprior = None
        self.lvposterior = None

    def freeze(self):
        self.frozen = True

    def unfreeze(self):
        self.frozen = False

    def forward(self, x_nchw, key, row_tile=None, compute_dtype=jnp.bfloat16,
                parallel_batch=False):
        # NOTE: the MXU consumes compute_dtype (bf16 by default) copies of x and the
        # sampled weight; lvposterior/lprior are evaluated on the f32 sample (same as
        # the PyTorch module, which also evaluates them on the un-rounded sample).
        Cout = self.out_channels
        if self.frozen:
            weight = self.weight_mu
            bias = self.bias_mu if self.has_bias else jnp.zeros((Cout,), jnp.float32)
        else:
            mus = [self.weight_mu] + ([self.bias_mu] if self.has_bias else [])
            rhos = [self.weight_rho] + ([self.bias_rho] if self.has_bias else [])
            samples, lvp, lpr = sample_gaussian_params(
                mus, rhos, key,
                prior_sigma_1=self.prior_sigma_1, prior_sigma_2=self.prior_sigma_2,
                prior_pi=self.prior_pi)
            weight = samples[0]
            bias = samples[1] if self.has_bias else jnp.zeros((Cout,), jnp.float32)
            self.lvposterior = lvp
            self.lprior = lpr
        self._last_weight = weight
        self._last_bias = bias

        # NCHW -> NHWC, Pallas conv, back to NCHW
        x_nhwc = jnp.transpose(x_nchw, (0, 2, 3, 1))
        out_nhwc = conv2d_pallas(x_nhwc, weight, bias,
                                 stride=self.stride, padding=self.padding,
                                 dilation=self.dilation, row_tile=row_tile,
                                 compute_dtype=compute_dtype,
                                 parallel_batch=parallel_batch)
        return jnp.transpose(out_nhwc, (0, 3, 1, 2))


# ----------------------------------------------------------------------------------
if __name__ == "__main__":
    key = jax.random.PRNGKey(0)
    k_x, k_params, k_fwd = jax.random.split(key, 3)

    N, Cin, H, W = 2, 4, 16, 16
    Cout, K = 8, 3
    x = jax.random.normal(k_x, (N, Cin, H, W), jnp.float32)

    layer = BayesConv2dPallas(Cin, Cout, K, stride=1, padding=1, dilation=1,
                              bias=True, key=k_params)

    # Default tiling: whole image in one band.
    out = jax.block_until_ready(layer.forward(x, k_fwd))
    assert out.shape == (N, Cout, H, W), out.shape

    # row_tile=6 -> 3 bands per image with a ragged last band: exercises the band
    # double buffering, the cross-image prefetch chain and the edge clipping.
    out_tiled = jax.block_until_ready(layer.forward(x, k_fwd, row_tile=6))

    # Reference conv with the same sampled weight/bias; operands rounded to bf16 exactly
    # like the kernel's MXU path (f32 accumulation in both).
    w_r = layer._last_weight.astype(jnp.bfloat16).astype(jnp.float32)
    x_r = x.astype(jnp.bfloat16).astype(jnp.float32)
    ref = lax.conv_general_dilated(
        x_r, w_r, window_strides=layer.stride,
        padding=[(layer.padding[0], layer.padding[0]),
                 (layer.padding[1], layer.padding[1])],
        rhs_dilation=layer.dilation,
        dimension_numbers=("NCHW", "OIHW", "NCHW"),
        precision=lax.Precision.HIGHEST,
        preferred_element_type=jnp.float32,
    ) + layer._last_bias.reshape(1, Cout, 1, 1)
    np.testing.assert_allclose(np.asarray(out), np.asarray(ref), rtol=2e-3, atol=2e-3)
    np.testing.assert_allclose(np.asarray(out_tiled), np.asarray(ref), rtol=2e-3, atol=2e-3)

    # Check the fused in-kernel lvposterior / lprior against plain-JAX evaluations.
    def log_normal(v, mu, sigma):
        return (-jnp.log(sigma) - 0.5 * jnp.log(2.0 * jnp.pi)
                - (v - mu) ** 2 / (2.0 * sigma ** 2))

    sig_w = jax.nn.softplus(layer.weight_rho)
    sig_b = jax.nn.softplus(layer.bias_rho)
    lvp_ref = (jnp.sum(log_normal(layer._last_weight, layer.weight_mu, sig_w))
               + jnp.sum(log_normal(layer._last_bias, layer.bias_mu, sig_b)))
    lpr_ref = (jnp.sum(log_normal(layer._last_weight, 0.0, layer.prior_sigma_1))
               + jnp.sum(log_normal(layer._last_bias, 0.0, layer.prior_sigma_1)))  # pi = 1
    np.testing.assert_allclose(float(layer.lvposterior), float(lvp_ref), rtol=2e-3, atol=0.2)
    np.testing.assert_allclose(float(layer.lprior), float(lpr_ref), rtol=2e-3, atol=0.2)

    print("KERNEL_OK")
</pallas_src>

<mosaic_0001>
module attributes {stable_mosaic.version = 11 : i64} {
  func.func @_sample_kernel_prng(%arg0: i32, %arg1: memref<1xi32, #tpu.memory_space<smem>>, %arg2: memref<8x128xf32, #tpu.memory_space<vmem>>, %arg3: memref<8x128xf32, #tpu.memory_space<vmem>>, %arg4: memref<8x128xf32, #tpu.memory_space<vmem>>, %arg5: memref<1x1xf32, #tpu.memory_space<vmem>>, %arg6: memref<1x1xf32, #tpu.memory_space<vmem>>) attributes {dimension_semantics = [#tpu.dimension_semantics<arbitrary>], iteration_bounds = array<i64: 1>, scalar_prefetch = 1 : i64, scratch_operands = 0 : i64, tpu.core_type = #tpu.core_type<tc>, window_params = [{transform_indices = @transform_0, window_bounds = array<i64: 8, 128>}, {transform_indices = @transform_1, window_bounds = array<i64: 8, 128>}, {transform_indices = @transform_2, window_bounds = array<i64: 8, 128>}, {pipeline_mode = #tpu.pipeline_mode<synchronous>, transform_indices = @transform_3, window_bounds = array<i64: 1, 1>}, {pipeline_mode = #tpu.pipeline_mode<synchronous>, transform_indices = @transform_4, window_bounds = array<i64: 1, 1>}]} {
    %c0_i32 = arith.constant 0 : i32
    %0 = arith.cmpi eq, %arg0, %c0_i32 : i32
    %1 = arith.extui %0 : i1 to i32
    %c0_i32_0 = arith.constant 0 : i32
    %2 = arith.cmpi ne, %1, %c0_i32_0 : i32
    scf.if %2 {
      %cst_55 = arith.constant 0.000000e+00 : f32
      %147 = vector.broadcast %cst_55 : f32 to vector<1x1xf32>
      %c0_56 = arith.constant 0 : index
      %c0_57 = arith.constant 0 : index
      %148 = vector.load %arg5[%c0_56, %c0_57] : memref<1x1xf32, #tpu.memory_space<vmem>>, vector<1x1xf32>
      tpu.vector_store %arg5[%c0_56, %c0_57], %147 {strides = array<i32>} : memref<1x1xf32, #tpu.memory_space<vmem>>, vector<1x1xf32>,
      %cst_58 = arith.constant 0.000000e+00 : f32
      %149 = vector.broadcast %cst_58 : f32 to vector<1x1xf32>
      %c0_59 = arith.constant 0 : index
      %c0_60 = arith.constant 0 : index
      %150 = vector.load %arg6[%c0_59, %c0_60] : memref<1x1xf32, #tpu.memory_space<vmem>>, vector<1x1xf32>
      tpu.vector_store %arg6[%c0_59, %c0_60], %149 {strides = array<i32>} : memref<1x1xf32, #tpu.memory_space<vmem>>, vector<1x1xf32>,
    } else {
    }
    %c0 = arith.constant 0 : index
    %3 = memref.load %arg1[%c0] : memref<1xi32, #tpu.memory_space<smem>>
    %4 = arith.addi %3, %arg0 : i32
    "tpu.prng_set_seed_32"(%4) : (i32) -> ()
    %c0_i32_1 = arith.constant 0 : i32
    %c0_i32_2 = arith.constant 0 : i32
    %cst = arith.constant -0.99999994 : f32
    %cst_3 = arith.constant 1.000000e+00 : f32
    %5 = vector.broadcast %cst : f32 to vector<1x1xf32>
    %6 = vector.broadcast %cst_3 : f32 to vector<1x1xf32>
    %7 = "tpu.prng_random_bits"() : () -> vector<8x128xi32>
    %c9_i32 = arith.constant 9 : i32
    %8 = vector.broadcast %c9_i32 : i32 to vector<8x128xi32>
    %9 = arith.shrui %7, %8 : vector<8x128xi32>
    %c1065353216_i32 = arith.constant 1065353216 : i32
    %10 = vector.broadcast %c1065353216_i32 : i32 to vector<8x128xi32>
    %11 = arith.ori %9, %10 : vector<8x128xi32>
    %12 = tpu.bitcast %11 : vector<8x128xi32> -> vector<8x128xf32>
    %cst_4 = arith.constant 1.000000e+00 : f32
    %13 = vector.broadcast %cst_4 : f32 to vector<8x128xf32>
    %14 = arith.subf %12, %13 : vector<8x128xf32>
    %15 = arith.subf %6, %5 : vector<1x1xf32>
    %16 = vector.broadcast %15 : vector<1x1xf32> to vector<8x128xf32>
    %17 = arith.mulf %14, %16 : vector<8x128xf32>
    %18 = vector.broadcast %5 : vector<1x1xf32> to vector<8x128xf32>
    %19 = arith.addf %17, %18 : vector<8x128xf32>
    %20 = vector.broadcast %5 : vector<1x1xf32> to vector<8x128xf32>
    %21 = arith.maximumf %20, %19 : vector<8x128xf32>
    %cst_5 = arith.constant 0.000000e+00 : f32
    %22 = vector.broadcast %cst_5 : f32 to vector<8x128xf32>
    %23 = arith.subf %22, %21 : vector<8x128xf32>
    %24 = arith.mulf %21, %23 : vector<8x128xf32>
    %25 = math.log1p %24 : vector<8x128xf32>
    %cst_6 = arith.constant 0.000000e+00 : f32
    %26 = vector.broadcast %cst_6 : f32 to vector<8x128xf32>
    %27 = arith.subf %26, %25 : vector<8x128xf32>
    %cst_7 = arith.constant 5.000000e+00 : f32
    %28 = vector.broadcast %cst_7 : f32 to vector<8x128xf32>
    %29 = arith.cmpf olt, %27, %28 : vector<8x128xf32>
    %cst_8 = arith.constant 2.500000e+00 : f32
    %30 = vector.broadcast %cst_8 : f32 to vector<8x128xf32>
    %31 = arith.subf %27, %30 : vector<8x128xf32>
    %32 = math.sqrt %27 : vector<8x128xf32>
    %cst_9 = arith.constant 3.000000e+00 : f32
    %33 = vector.broadcast %cst_9 : f32 to vector<8x128xf32>
    %34 = arith.subf %32, %33 : vector<8x128xf32>
    %35 = arith.select %29, %31, %34 : vector<8x128xi1>, vector<8x128xf32>
    %cst_10 = arith.constant 2.81022636E-8 : f32
    %cst_11 = arith.constant -2.00214257E-4 : f32
    %36 = vector.broadcast %cst_10 : f32 to vector<8x128xf32>
    %37 = vector.broadcast %cst_11 : f32 to vector<8x128xf32>
    %38 = arith.select %29, %36, %37 : vector<8x128xi1>, vector<8x128xf32>
    %cst_12 = arith.constant 3.43273939E-7 : f32
    %cst_13 = arith.constant 1.00950558E-4 : f32
    %39 = vector.broadcast %cst_12 : f32 to vector<8x128xf32>
    %40 = vector.broadcast %cst_13 : f32 to vector<8x128xf32>
    %41 = arith.select %29, %39, %40 : vector<8x128xi1>, vector<8x128xf32>
    %42 = arith.mulf %38, %35 : vector<8x128xf32>
    %43 = arith.addf %41, %42 : vector<8x128xf32>
    %cst_14 = arith.constant -3.5233877E-6 : f32
    %cst_15 = arith.constant 0.00134934322 : f32
    %44 = vector.broadcast %cst_14 : f32 to vector<8x128xf32>
    %45 = vector.broadcast %cst_15 : f32 to vector<8x128xf32>
    %46 = arith.select %29, %44, %45 : vector<8x128xi1>, vector<8x128xf32>
    %47 = arith.mulf %43, %35 : vector<8x128xf32>
    %48 = arith.addf %46, %47 : vector<8x128xf32>
    %cst_16 = arith.constant -4.39150654E-6 : f32
    %cst_17 = arith.constant -0.00367342844 : f32
    %49 = vector.broadcast %cst_16 : f32 to vector<8x128xf32>
    %50 = vector.broadcast %cst_17 : f32 to vector<8x128xf32>
    %51 = arith.select %29, %49, %50 : vector<8x128xi1>, vector<8x128xf32>
    %52 = arith.mulf %48, %35 : vector<8x128xf32>
    %53 = arith.addf %51, %52 : vector<8x128xf32>
    %cst_18 = arith.constant 2.1858087E-4 : f32
    %cst_19 = arith.constant 0.00573950773 : f32
    %54 = vector.broadcast %cst_18 : f32 to vector<8x128xf32>
    %55 = vector.broadcast %cst_19 : f32 to vector<8x128xf32>
    %56 = arith.select %29, %54, %55 : vector<8x128xi1>, vector<8x128xf32>
    %57 = arith.mulf %53, %35 : vector<8x128xf32>
    %58 = arith.addf %56, %57 : vector<8x128xf32>
    %cst_20 = arith.constant -0.00125372503 : f32
    %cst_21 = arith.constant -0.0076224613 : f32
    %59 = vector.broadcast %cst_20 : f32 to vector<8x128xf32>
    %60 = vector.broadcast %cst_21 : f32 to vector<8x128xf32>
    %61 = arith.select %29, %59, %60 : vector<8x128xi1>, vector<8x128xf32>
    %62 = arith.mulf %58, %35 : vector<8x128xf32>
    %63 = arith.addf %61, %62 : vector<8x128xf32>
    %cst_22 = arith.constant -0.00417768164 : f32
    %cst_23 = arith.constant 0.00943887047 : f32
    %64 = vector.broadcast %cst_22 : f32 to vector<8x128xf32>
    %65 = vector.broadcast %cst_23 : f32 to vector<8x128xf32>
    %66 = arith.select %29, %64, %65 : vector<8x128xi1>, vector<8x128xf32>
    %67 = arith.mulf %63, %35 : vector<8x128xf32>
    %68 = arith.addf %66, %67 : vector<8x128xf32>
    %cst_24 = arith.constant 0.246640727 : f32
    %cst_25 = arith.constant 1.00167406 : f32
    %69 = vector.broadcast %cst_24 : f32 to vector<8x128xf32>
    %70 = vector.broadcast %cst_25 : f32 to vector<8x128xf32>
    %71 = arith.select %29, %69, %70 : vector<8x128xi1>, vector<8x128xf32>
    %72 = arith.mulf %68, %35 : vector<8x128xf32>
    %73 = arith.addf %71, %72 : vector<8x128xf32>
    %cst_26 = arith.constant 1.50140941 : f32
    %cst_27 = arith.constant 2.83297682 : f32
    %74 = vector.broadcast %cst_26 : f32 to vector<8x128xf32>
    %75 = vector.broadcast %cst_27 : f32 to vector<8x128xf32>
    %76 = arith.select %29, %74, %75 : vector<8x128xi1>, vector<8x128xf32>
    %77 = arith.mulf %73, %35 : vector<8x128xf32>
    %78 = arith.addf %76, %77 : vector<8x128xf32>
    %79 = math.absf %21 : vector<8x128xf32>
    %cst_28 = arith.constant 1.000000e+00 : f32
    %80 = vector.broadcast %cst_28 : f32 to vector<8x128xf32>
    %81 = arith.cmpf oeq, %79, %80 : vector<8x128xf32>
    %cst_29 = arith.constant 0x7F800000 : f32
    %82 = vector.broadcast %cst_29 : f32 to vector<8x128xf32>
    %83 = arith.mulf %82, %21 : vector<8x128xf32>
    %84 = arith.mulf %78, %21 : vector<8x128xf32>
    %85 = arith.select %81, %83, %84 : vector<8x128xi1>, vector<8x128xf32>
    %cst_30 = arith.constant 1.41421354 : f32
    %86 = vector.broadcast %cst_30 : f32 to vector<8x128xf32>
    %87 = arith.mulf %86, %85 : vector<8x128xf32>
    %c0_31 = arith.constant 0 : index
    %c0_32 = arith.constant 0 : index
    %88 = vector.load %arg2[%c0_31, %c0_32] : memref<8x128xf32, #tpu.memory_space<vmem>>, vector<8x128xf32>
    %c0_33 = arith.constant 0 : index
    %c0_34 = arith.constant 0 : index
    %89 = vector.load %arg3[%c0_33, %c0_34] : memref<8x128xf32, #tpu.memory_space<vmem>>, vector<8x128xf32>
    %cst_35 = arith.constant 0.000000e+00 : f32
    %90 = vector.broadcast %cst_35 : f32 to vector<8x128xf32>
    %91 = arith.maximumf %89, %90 : vector<8x128xf32>
    %92 = math.absf %89 : vector<8x128xf32>
    %cst_36 = arith.constant 0.000000e+00 : f32
    %93 = vector.broadcast %cst_36 : f32 to vector<8x128xf32>
    %94 = arith.subf %93, %92 : vector<8x128xf32>
    %95 = math.exp %94 : vector<8x128xf32>
    %96 = math.log1p %95 : vector<8x128xf32>
    %97 = arith.addf %91, %96 : vector<8x128xf32>
    %98 = arith.mulf %97, %87 : vector<8x128xf32>
    %99 = arith.addf %88, %98 : vector<8x128xf32>
    %c0_37 = arith.constant 0 : index
    %c0_38 = arith.constant 0 : index
    %100 = vector.load %arg4[%c0_37, %c0_38] : memref<8x128xf32, #tpu.memory_space<vmem>>, vector<8x128xf32>
    tpu.vector_store %arg4[%c0_37, %c0_38], %99 {strides = array<i32>} : memref<8x128xf32, #tpu.memory_space<vmem>>, vector<8x128xf32>,
    %101 = tpu.iota {dimensions = array<i32: 0>} : vector<8x128xi32>
    %102 = tpu.iota {dimensions = array<i32: 1>} : vector<8x128xi32>
    %c8_i32 = arith.constant 8 : i32
    %103 = arith.muli %arg0, %c8_i32 : i32
    %104 = vector.broadcast %103 : i32 to vector<8x128xi32>
    %105 = arith.addi %104, %101 : vector<8x128xi32>
    %c128_i32 = arith.constant 128 : i32
    %106 = vector.broadcast %c128_i32 : i32 to vector<8x128xi32>
    %107 = arith.muli %105, %106 : vector<8x128xi32>
    %108 = arith.addi %107, %102 : vector<8x128xi32>
    %c296_i32 = arith.constant 296 : i32
    %109 = vector.broadcast %c296_i32 : i32 to vector<8x128xi32>
    %110 = arith.cmpi slt, %108, %109 : vector<8x128xi32>
    %111 = arith.extui %110 : vector<8x128xi1> to vector<8x128xi32>
    %112 = arith.sitofp %111 : vector<8x128xi32> to vector<8x128xf32>
    %113 = math.log %97 : vector<8x128xf32>
    %cst_39 = arith.constant 5.000000e-01 : f32
    %114 = vector.broadcast %cst_39 : f32 to vector<8x128xf32>
    %115 = arith.mulf %114, %87 : vector<8x128xf32>
    %116 = arith.mulf %115, %87 : vector<8x128xf32>
    %117 = arith.addf %113, %116 : vector<8x128xf32>
    %cst_40 = arith.constant 0.918938517 : f32
    %118 = vector.broadcast %cst_40 : f32 to vector<8x128xf32>
    %119 = arith.addf %117, %118 : vector<8x128xf32>
    %cst_41 = arith.constant 0.000000e+00 : f32
    %120 = vector.broadcast %cst_41 : f32 to vector<8x128xf32>
    %121 = arith.subf %120, %119 : vector<8x128xf32>
    %cst_42 = arith.constant 1.000000e-01 : f32
    %122 = vector.broadcast %cst_42 : f32 to vector<8x128xf32>
    %123 = arith.divf %99, %122 : vector<8x128xf32>
    %124 = arith.mulf %123, %123 : vector<8x128xf32>
    %cst_43 = arith.constant 5.000000e-01 : f32
    %125 = vector.broadcast %cst_43 : f32 to vector<8x128xf32>
    %126 = arith.mulf %125, %124 : vector<8x128xf32>
    %cst_44 = arith.constant 1.38364661 : f32
    %127 = vector.broadcast %cst_44 : f32 to vector<8x128xf32>
    %128 = arith.subf %127, %126 : vector<8x128xf32>
    %c0_45 = arith.constant 0 : index
    %c0_46 = arith.constant 0 : index
    %129 = vector.load %arg5[%c0_45, %c0_46] : memref<1x1xf32, #tpu.memory_space<vmem>>, vector<1x1xf32>
    %130 = arith.mulf %112, %121 : vector<8x128xf32>
    %131 = vector.shape_cast %130 : vector<8x128xf32> to vector<1x8x128xf32>
    %cst_47 = arith.constant dense<0.000000e+00> : vector<1xf32>
    %132 = vector.multi_reduction <add>, %131, %cst_47 [1, 2] : vector<1x8x128xf32> to vector<1xf32>
    %133 = vector.shape_cast %132 : vector<1xf32> to vector<1x1x1xf32>
    %134 = vector.extract %133[0, 0, 0] : f32 from vector<1x1x1xf32>
    %135 = vector.broadcast %134 : f32 to vector<1x1xf32>
    %136 = arith.addf %129, %135 : vector<1x1xf32>
    %c0_48 = arith.constant 0 : index
    %c0_49 = arith.constant 0 : index
    %137 = vector.load %arg5[%c0_48, %c0_49] : memref<1x1xf32, #tpu.memory_space<vmem>>, vector<1x1xf32>
    tpu.vector_store %arg5[%c0_48, %c0_49], %136 {strides = array<i32>} : memref<1x1xf32, #tpu.memory_space<vmem>>, vector<1x1xf32>,
    %c0_50 = arith.constant 0 : index
    %c0_51 = arith.constant 0 : index
    %138 = vector.load %arg6[%c0_50, %c0_51] : memref<1x1xf32, #tpu.memory_space<vmem>>, vector<1x1xf32>
    %139 = arith.mulf %112, %128 : vector<8x128xf32>
    %140 = vector.shape_cast %139 : vector<8x128xf32> to vector<1x8x128xf32>
    %cst_52 = arith.constant dense<0.000000e+00> : vector<1xf32>
    %141 = vector.multi_reduction <add>, %140, %cst_52 [1, 2] : vector<1x8x128xf32> to vector<1xf32>
    %142 = vector.shape_cast %141 : vector<1xf32> to vector<1x1x1xf32>
    %143 = vector.extract %142[0, 0, 0] : f32 from vector<1x1x1xf32>
    %144 = vector.broadcast %143 : f32 to vector<1x1xf32>
    %145 = arith.addf %138, %144 : vector<1x1xf32>
    %c0_53 = arith.constant 0 : index
    %c0_54 = arith.constant 0 : index
    %146 = vector.load %arg6[%c0_53, %c0_54] : memref<1x1xf32, #tpu.memory_space<vmem>>, vector<1x1xf32>
    tpu.vector_store %arg6[%c0_53, %c0_54], %145 {strides = array<i32>} : memref<1x1xf32, #tpu.memory_space<vmem>>, vector<1x1xf32>,
    return
  }
  func.func @transform_0(%arg0: i32, %arg1: memref<1xi32, #tpu.memory_space<smem>>) -> (i32, i32) {
    %c0_i32 = arith.constant 0 : i32
    %c0_i32_0 = arith.constant 0 : i32
    return %arg0, %c0_i32 : i32, i32
  }
  func.func @transform_1(%arg0: i32, %arg1: memref<1xi32, #tpu.memory_space<smem>>) -> (i32, i32) {
    %c0_i32 = arith.constant 0 : i32
    %c0_i32_0 = arith.constant 0 : i32
    return %arg0, %c0_i32 : i32, i32
  }
  func.func @transform_2(%arg0: i32, %arg1: memref<1xi32, #tpu.memory_space<smem>>) -> (i32, i32) {
    %c0_i32 = arith.constant 0 : i32
    %c0_i32_0 = arith.constant 0 : i32
    return %arg0, %c0_i32 : i32, i32
  }
  func.func @transform_3(%arg0: i32, %arg1: memref<1xi32, #tpu.memory_space<smem>>) -> (i32, i32) {
    %c0_i32 = arith.constant 0 : i32
    %c0_i32_0 = arith.constant 0 : i32
    %c0_i32_1 = arith.constant 0 : i32
    return %c0_i32, %c0_i32_0 : i32, i32
  }
  func.func @transform_4(%arg0: i32, %arg1: memref<1xi32, #tpu.memory_space<smem>>) -> (i32, i32) {
    %c0_i32 = arith.constant 0 : i32
    %c0_i32_0 = arith.constant 0 : i32
    %c0_i32_1 = arith.constant 0 : i32
    return %c0_i32, %c0_i32_0 : i32, i32
  }
}

module attributes {stable_mosaic.version = 11 : i64} {
  func.func @_sample_kernel_eps(%arg0: i32, %arg1: memref<8x128xf32, #tpu.memory_space<vmem>>, %arg2: memref<8x128xf32, #tpu.memory_space<vmem>>, %arg3: memref<8x128xf32, #tpu.memory_space<vmem>>, %arg4: memref<8x128xf32, #tpu.memory_space<vmem>>, %arg5: memref<1x1xf32, #tpu.memory_space<vmem>>, %arg6: memref<1x1xf32, #tpu.memory_space<vmem>>) attributes {dimension_semantics = [#tpu.dimension_semantics<arbitrary>], iteration_bounds = array<i64: 1>, scalar_prefetch = 0 : i64, scratch_operands = 0 : i64, tpu.core_type = #tpu.core_type<tc>, window_params = [{transform_indices = @transform_0, window_bounds = array<i64: 8, 128>}, {transform_indices = @transform_1, window_bounds = array<i64: 8, 128>}, {transform_indices = @transform_2, window_bounds = array<i64: 8, 128>}, {transform_indices = @transform_3, window_bounds = array<i64: 8, 128>}, {pipeline_mode = #tpu.pipeline_mode<synchronous>, transform_indices = @transform_4, window_bounds = array<i64: 1, 1>}, {pipeline_mode = #tpu.pipeline_mode<synchronous>, transform_indices = @transform_5, window_bounds = array<i64: 1, 1>}]} {
    %c0_i32 = arith.constant 0 : i32
    %0 = arith.cmpi eq, %arg0, %c0_i32 : i32
    %1 = arith.extui %0 : i1 to i32
    %c0_i32_0 = arith.constant 0 : i32
    %2 = arith.cmpi ne, %1, %c0_i32_0 : i32
    scf.if %2 {
      %cst_25 = arith.constant 0.000000e+00 : f32
      %63 = vector.broadcast %cst_25 : f32 to vector<1x1xf32>
      %c0_26 = arith.constant 0 : index
      %c0_27 = arith.constant 0 : index
      %64 = vector.load %arg5[%c0_26, %c0_27] : memref<1x1xf32, #tpu.memory_space<vmem>>, vector<1x1xf32>
      tpu.vector_store %arg5[%c0_26, %c0_27], %63 {strides = array<i32>} : memref<1x1xf32, #tpu.memory_space<vmem>>, vector<1x1xf32>,
      %cst_28 = arith.constant 0.000000e+00 : f32
      %65 = vector.broadcast %cst_28 : f32 to vector<1x1xf32>
      %c0_29 = arith.constant 0 : index
      %c0_30 = arith.constant 0 : index
      %66 = vector.load %arg6[%c0_29, %c0_30] : memref<1x1xf32, #tpu.memory_space<vmem>>, vector<1x1xf32>
      tpu.vector_store %arg6[%c0_29, %c0_30], %65 {strides = array<i32>} : memref<1x1xf32, #tpu.memory_space<vmem>>, vector<1x1xf32>,
    } else {
    }
    %c0 = arith.constant 0 : index
    %c0_1 = arith.constant 0 : index
    %3 = vector.load %arg1[%c0, %c0_1] : memref<8x128xf32, #tpu.memory_space<vmem>>, vector<8x128xf32>
    %c0_2 = arith.constant 0 : index
    %c0_3 = arith.constant 0 : index
    %4 = vector.load %arg2[%c0_2, %c0_3] : memref<8x128xf32, #tpu.memory_space<vmem>>, vector<8x128xf32>
    %c0_4 = arith.constant 0 : index
    %c0_5 = arith.constant 0 : index
    %5 = vector.load %arg3[%c0_4, %c0_5] : memref<8x128xf32, #tpu.memory_space<vmem>>, vector<8x128xf32>
    %cst = arith.constant 0.000000e+00 : f32
    %6 = vector.broadcast %cst : f32 to vector<8x128xf32>
    %7 = arith.maximumf %4, %6 : vector<8x128xf32>
    %8 = math.absf %4 : vector<8x128xf32>
    %cst_6 = arith.constant 0.000000e+00 : f32
    %9 = vector.broadcast %cst_6 : f32 to vector<8x128xf32>
    %10 = arith.subf %9, %8 : vector<8x128xf32>
    %11 = math.exp %10 : vector<8x128xf32>
    %12 = math.log1p %11 : vector<8x128xf32>
    %13 = arith.addf %7, %12 : vector<8x128xf32>
    %14 = arith.mulf %13, %5 : vector<8x128xf32>
    %15 = arith.addf %3, %14 : vector<8x128xf32>
    %c0_7 = arith.constant 0 : index
    %c0_8 = arith.constant 0 : index
    %16 = vector.load %arg4[%c0_7, %c0_8] : memref<8x128xf32, #tpu.memory_space<vmem>>, vector<8x128xf32>
    tpu.vector_store %arg4[%c0_7, %c0_8], %15 {strides = array<i32>} : memref<8x128xf32, #tpu.memory_space<vmem>>, vector<8x128xf32>,
    %17 = tpu.iota {dimensions = array<i32: 0>} : vector<8x128xi32>
    %18 = tpu.iota {dimensions = array<i32: 1>} : vector<8x128xi32>
    %c8_i32 = arith.constant 8 : i32
    %19 = arith.muli %arg0, %c8_i32 : i32
    %20 = vector.broadcast %19 : i32 to vector<8x128xi32>
    %21 = arith.addi %20, %17 : vector<8x128xi32>
    %c128_i32 = arith.constant 128 : i32
    %22 = vector.broadcast %c128_i32 : i32 to vector<8x128xi32>
    %23 = arith.muli %21, %22 : vector<8x128xi32>
    %24 = arith.addi %23, %18 : vector<8x128xi32>
    %c296_i32 = arith.constant 296 : i32
    %25 = vector.broadcast %c296_i32 : i32 to vector<8x128xi32>
    %26 = arith.cmpi slt, %24, %25 : vector<8x128xi32>
    %27 = arith.extui %26 : vector<8x128xi1> to vector<8x128xi32>
    %28 = arith.sitofp %27 : vector<8x128xi32> to vector<8x128xf32>
    %29 = math.log %13 : vector<8x128xf32>
    %cst_9 = arith.constant 5.000000e-01 : f32
    %30 = vector.broadcast %cst_9 : f32 to vector<8x128xf32>
    %31 = arith.mulf %30, %5 : vector<8x128xf32>
    %32 = arith.mulf %31, %5 : vector<8x128xf32>
    %33 = arith.addf %29, %32 : vector<8x128xf32>
    %cst_10 = arith.constant 0.918938517 : f32
    %34 = vector.broadcast %cst_10 : f32 to vector<8x128xf32>
    %35 = arith.addf %33, %34 : vector<8x128xf32>
    %cst_11 = arith.constant 0.000000e+00 : f32
    %36 = vector.broadcast %cst_11 : f32 to vector<8x128xf32>
    %37 = arith.subf %36, %35 : vector<8x128xf32>
    %cst_12 = arith.constant 1.000000e-01 : f32
    %38 = vector.broadcast %cst_12 : f32 to vector<8x128xf32>
    %39 = arith.divf %15, %38 : vector<8x128xf32>
    %40 = arith.mulf %39, %39 : vector<8x128xf32>
    %cst_13 = arith.constant 5.000000e-01 : f32
    %41 = vector.broadcast %cst_13 : f32 to vector<8x128xf32>
    %42 = arith.mulf %41, %40 : vector<8x128xf32>
    %cst_14 = arith.constant 1.38364661 : f32
    %43 = vector.broadcast %cst_14 : f32 to vector<8x128xf32>
    %44 = arith.subf %43, %42 : vector<8x128xf32>
    %c0_15 = arith.constant 0 : index
    %c0_16 = arith.constant 0 : index
    %45 = vector.load %arg5[%c0_15, %c0_16] : memref<1x1xf32, #tpu.memory_space<vmem>>, vector<1x1xf32>
    %46 = arith.mulf %28, %37 : vector<8x128xf32>
    %47 = vector.shape_cast %46 : vector<8x128xf32> to vector<1x8x128xf32>
    %cst_17 = arith.constant dense<0.000000e+00> : vector<1xf32>
    %48 = vector.multi_reduction <add>, %47, %cst_17 [1, 2] : vector<1x8x128xf32> to vector<1xf32>
    %49 = vector.shape_cast %48 : vector<1xf32> to vector<1x1x1xf32>
    %50 = vector.extract %49[0, 0, 0] : f32 from vector<1x1x1xf32>
    %51 = vector.broadcast %50 : f32 to vector<1x1xf32>
    %52 = arith.addf %45, %51 : vector<1x1xf32>
    %c0_18 = arith.constant 0 : index
    %c0_19 = arith.constant 0 : index
    %53 = vector.load %arg5[%c0_18, %c0_19] : memref<1x1xf32, #tpu.memory_space<vmem>>, vector<1x1xf32>
    tpu.vector_store %arg5[%c0_18, %c0_19], %52 {strides = array<i32>} : memref<1x1xf32, #tpu.memory_space<vmem>>, vector<1x1xf32>,
    %c0_20 = arith.constant 0 : index
    %c0_21 = arith.constant 0 : index
    %54 = vector.load %arg6[%c0_20, %c0_21] : memref<1x1xf32, #tpu.memory_space<vmem>>, vector<1x1xf32>
    %55 = arith.mulf %28, %44 : vector<8x128xf32>
    %56 = vector.shape_cast %55 : vector<8x128xf32> to vector<1x8x128xf32>
    %cst_22 = arith.constant dense<0.000000e+00> : vector<1xf32>
    %57 = vector.multi_reduction <add>, %56, %cst_22 [1, 2] : vector<1x8x128xf32> to vector<1xf32>
    %58 = vector.shape_cast %57 : vector<1xf32> to vector<1x1x1xf32>
    %59 = vector.extract %58[0, 0, 0] : f32 from vector<1x1x1xf32>
    %60 = vector.broadcast %59 : f32 to vector<1x1xf32>
    %61 = arith.addf %54, %60 : vector<1x1xf32>
    %c0_23 = arith.constant 0 : index
    %c0_24 = arith.constant 0 : index
    %62 = vector.load %arg6[%c0_23, %c0_24] : memref<1x1xf32, #tpu.memory_space<vmem>>, vector<1x1xf32>
    tpu.vector_store %arg6[%c0_23, %c0_24], %61 {strides = array<i32>} : memref<1x1xf32, #tpu.memory_space<vmem>>, vector<1x1xf32>,
    return
  }
  func.func @transform_0(%arg0: i32) -> (i32, i32) {
    %c0_i32 = arith.constant 0 : i32
    %c0_i32_0 = arith.constant 0 : i32
    return %arg0, %c0_i32 : i32, i32
  }
  func.func @transform_1(%arg0: i32) -> (i32, i32) {
    %c0_i32 = arith.constant 0 : i32
    %c0_i32_0 = arith.constant 0 : i32
    return %arg0, %c0_i32 : i32, i32
  }
  func.func @transform_2(%arg0: i32) -> (i32, i32) {
    %c0_i32 = arith.constant 0 : i32
    %c0_i32_0 = arith.constant 0 : i32
    return %arg0, %c0_i32 : i32, i32
  }
  func.func @transform_3(%arg0: i32) -> (i32, i32) {
    %c0_i32 = arith.constant 0 : i32
    %c0_i32_0 = arith.constant 0 : i32
    return %arg0, %c0_i32 : i32, i32
  }
  func.func @transform_4(%arg0: i32) -> (i32, i32) {
    %c0_i32 = arith.constant 0 : i32
    %c0_i32_0 = arith.constant 0 : i32
    %c0_i32_1 = arith.constant 0 : i32
    return %c0_i32, %c0_i32_0 : i32, i32
  }
  func.func @transform_5(%arg0: i32) -> (i32, i32) {
    %c0_i32 = arith.constant 0 : i32
    %c0_i32_0 = arith.constant 0 : i32
    %c0_i32_1 = arith.constant 0 : i32
    return %c0_i32, %c0_i32_0 : i32, i32
  }
}

</mosaic_0001>

<bundles_post_ra>
// kernel: tpu_custom_call.1
= control target key start
LH: loop header
LB: loop body
LE: loop exit
PB: predicated region body
PF: predicated region fallthrough
CT: control target
= control target key end

     0   :  { %12 = vsyncpa [#allocation5], 0  ;;  %s599_s0 = inlined_call_operand.<no memory space> [shape: s32[1], index: 0, kind: input, shape index: {}]   ;;  %s600_s1 = inlined_call_operand.hbm [shape: f32[8,128], index: 1, kind: input, shape index: {}]   ;;  %s601_s2 = inlined_call_operand.hbm [shape: f32[8,128], index: 2, kind: input, shape index: {}]   ;;  %s602_s3 = inlined_call_operand.hbm [shape: f32[8,128], index: 3, kind: output, shape index: {0}]   ;;  %s603_s4 = inlined_call_operand.hbm [shape: f32[1,1], index: 4, kind: output, shape index: {1}]   ;;  %s604_s5 = inlined_call_operand.hbm [shape: f32[1,1], index: 5, kind: output, shape index: {2}]  }
   0x1   :  { %13 = vsyncpa [#allocation8], 0 }
   0x2   :  { %14 = vsyncpa [#allocation6], 0 }
   0x3   :  { %15 = vsyncpa [#allocation11], 0  ;;  %s492_s18 = smov [#allocation4]   ;;  %s493_s20 = smov [#allocation7]  }
   0x4   :  { %s22_s19 = sshll.u32 %s492_s18, 4  ;;  %s32_s21 = sshll.u32 %s493_s20, 4  ;;  %s23_s19 = int_to_ptr.vmem [resolvable:$true] %s22_s19  ;;  %s33_s21 = int_to_ptr.vmem [resolvable:$true] %s32_s21 }
   0x5   :  { %s392_s22 = scalar_lea.vmem %s23_s19, 128  ;;  %p397_p1 = scmp.lt.s32.totalorder %s23_s19, %s23_s19 }
   0x6   :  { %p393_p0 = scmp.ne.s32.totalorder %s23_s19, %s392_s22  ;;  %p398_p2 = scmp.lt.s32.totalorder %s392_s22, %s392_s22 }
   0x8   :  { %p399_p3 = por %p398_p2, %p397_p1 }
   0xa   :  { %p400_p4 = pnand %p399_p3, %p393_p0 }
   0xc   :  { %403 = shalt.err (!%p400_p4)
}
   0xd   :  { %25 = dma.hbm_to_vmem [thread:$0]  %s600_s1, 128, %s23_s19, [#allocation5]  }
   0xe   :  { %s412_s25 = scalar_lea.vmem %s33_s21, 128  ;;  %p417_p6 = scmp.lt.s32.totalorder %s33_s21, %s33_s21 }
   0xf   :  { %p413_p5 = scmp.ne.s32.totalorder %s33_s21, %s412_s25  ;;  %p418_p7 = scmp.lt.s32.totalorder %s412_s25, %s412_s25 }
  0x11   :  { %p419_p8 = por %p418_p7, %p417_p6 }
  0x13   :  { %p420_p9 = pnand %p419_p8, %p413_p5 }
  0x15   :  { %423 = shalt.err (!%p420_p9)
}
  0x16   :  { %35 = dma.hbm_to_vmem [thread:$0]  %s601_s2, 128, %s33_s21, [#allocation8]  }
  0x17   :  { %484 = dma.done.wait [#allocation5], 128  }
  0x18   :  { %485 = vsyncadd [#allocation5], 4294967168  ;;  %v51_v0 = vlaneseq  ;;  %v546_v1 = vstv %s599_s0 }
  0x19   :  { %486 = dma.done.wait [#allocation8], 128  }
  0x1a   :  { %487 = vsyncadd [#allocation8], 4294967168  ;;  %v55_v2 = vadd.s32 %v546_v1, %v51_v0  ;;  %v53_v17 = vxor.u32 %v546_v1, %v546_v1  ;;  %vm46_vm0 = vcmask 0   ;;  %v494_v51 = vmov 0.0   ;;  %s504_s0 = smov [#allocation9]  }
  0x1b   :  { %47 = vst.msk [vmem:[#allocation10] sm:$0x1] %vm46_vm0, %v494_v51  ;;  %48 = vst.msk [vmem:[#allocation12] sm:$0x1] %vm46_vm0, %v494_v51  ;;  %s314_s1 = sshll.u32 %s504_s0, 4  ;;  %s315_s1 = int_to_ptr.vmem [resolvable:$true] %s314_s1 }
  0x1c   :  { %v56_v3 = vadd.s32 %v55_v2, %v55_v2  ;;  %v57_v4 = vshll.u32 %v55_v2, 13  ;;  %v58_v5 = vshrl.u32 %v55_v2, 19  ;;  %v552_v22 = vxor.u32 466688986, %v53_v17  ;;  %s424_s2 = scalar_lea.vmem %s315_s1, 128  ;;  %p429_p11 = scmp.lt.s32.totalorder %s315_s1, %s315_s1 }
  0x1d   :  { %p425_p10 = scmp.ne.s32.totalorder %s315_s1, %s424_s2  ;;  %p430_p12 = scmp.lt.s32.totalorder %s424_s2, %s424_s2 }
  0x1e   :  { %v59_v6 = vor.u32 %v58_v5, %v57_v4 }
  0x1f   :  { %p431_p13 = por %p430_p12, %p429_p11 }
  0x20   :  { %v60_v7 = vxor.u32 %v59_v6, %v56_v3 }
  0x21   :  { %p432_p0 = pnand %p431_p13, %p425_p10 }
  0x22   :  { %v61_v8 = vadd.s32 %v60_v7, %v56_v3  ;;  %v62_v9 = vshll.u32 %v60_v7, 15  ;;  %v63_v10 = vshrl.u32 %v60_v7, 17 }
  0x24   :  { %v64_v11 = vor.u32 %v63_v10, %v62_v9 }
  0x26   :  { %v65_v12 = vxor.u32 %v64_v11, %v61_v8 }
  0x28   :  { %v66_v13 = vadd.s32 %v65_v12, %v61_v8  ;;  %v67_v14 = vshll.u32 %v65_v12, 26  ;;  %v68_v15 = vshrl.u32 %v65_v12, 6 }
  0x2a   :  { %v69_v16 = vor.u32 %v68_v15, %v67_v14 }
  0x2c   :  { %v70_v18 = vxor.u32 %v69_v16, %v66_v13 }
  0x2e   :  { %v71_v19 = vadd.s32 %v70_v18, %v66_v13  ;;  %v72_v20 = vshll.u32 %v70_v18, 6  ;;  %v73_v21 = vshrl.u32 %v70_v18, 26 }
  0x30   :  { %v74_v23 = vor.u32 %v73_v21, %v72_v20  ;;  %v76_v25 = vadd.s32 %v71_v19, %v546_v1 }
  0x32   :  { %v75_v24 = vxor.u32 %v74_v23, %v71_v19 }
  0x34   :  { %v77_v26 = vadd.s32 %v75_v24, %v552_v22 }
  0x36   :  { %v78_v27 = vadd.s32 1, %v77_v26 }
  0x38   :  { %v79_v28 = vadd.s32 %v78_v27, %v76_v25  ;;  %v80_v29 = vshll.u32 %v78_v27, 17  ;;  %v81_v30 = vshrl.u32 %v78_v27, 15 }
  0x3a   :  { %v82_v31 = vor.u32 %v81_v30, %v80_v29 }
  0x3c   :  { %v83_v32 = vxor.u32 %v82_v31, %v79_v28 }
  0x3e   :  { %v84_v33 = vadd.s32 %v83_v32, %v79_v28  ;;  %v85_v34 = vshll.u32 %v83_v32, 29  ;;  %v86_v35 = vshrl.u32 %v83_v32, 3 }
  0x40   :  { %v87_v36 = vor.u32 %v86_v35, %v85_v34 }
  0x42   :  { %v88_v37 = vxor.u32 %v87_v36, %v84_v33 }
  0x44   :  { %v89_v38 = vadd.s32 %v88_v37, %v84_v33  ;;  %v90_v39 = vshll.u32 %v88_v37, 16  ;;  %v91_v40 = vshrl.u32 %v88_v37, 16 }
  0x46   :  { %v92_v41 = vor.u32 %v91_v40, %v90_v39 }
  0x48   :  { %v93_v42 = vxor.u32 %v92_v41, %v89_v38 }
  0x4a   :  { %v94_v43 = vadd.s32 %v93_v42, %v89_v38  ;;  %v95_v44 = vshll.u32 %v93_v42, 24  ;;  %v96_v45 = vshrl.u32 %v93_v42, 8 }
  0x4c   :  { %v97_v46 = vor.u32 %v96_v45, %v95_v44  ;;  %v99_v48 = vadd.s32 %v94_v43, %v552_v22 }
  0x4e   :  { %v98_v47 = vxor.u32 %v97_v46, %v94_v43 }
  0x50   :  { %v100_v49 = vadd.s32 %v98_v47, %v546_v1 }
  0x52   :  { %v101_v50 = vadd.s32 2, %v100_v49 }
  0x54   :  { %v102_v52 = vadd.s32 %v101_v50, %v99_v48  ;;  %v103_v53 = vshll.u32 %v101_v50, 13  ;;  %v104_v54 = vshrl.u32 %v101_v50, 19 }
  0x56   :  { %v105_v55 = vor.u32 %v104_v54, %v103_v53 }
  0x58   :  { %v106_v56 = vxor.u32 %v105_v55, %v102_v52 }
  0x5a   :  { %v107_v57 = vadd.s32 %v106_v56, %v102_v52  ;;  %v108_v58 = vshll.u32 %v106_v56, 15  ;;  %v109_v59 = vshrl.u32 %v106_v56, 17 }
  0x5c   :  { %v110_v60 = vor.u32 %v109_v59, %v108_v58 }
  0x5e   :  { %v111_v61 = vxor.u32 %v110_v60, %v107_v57 }
  0x60   :  { %v112_v62 = vadd.s32 %v111_v61, %v107_v57  ;;  %v113_v63 = vshll.u32 %v111_v61, 26  ;;  %v114_v2 = vshrl.u32 %v111_v61, 6 }
  0x62   :  { %v115_v3 = vor.u32 %v114_v2, %v113_v63 }
  0x64   :  { %v116_v4 = vxor.u32 %v115_v3, %v112_v62 }
  0x66   :  { %v117_v5 = vadd.s32 %v116_v4, %v112_v62  ;;  %v118_v6 = vshll.u32 %v116_v4, 6  ;;  %v119_v7 = vshrl.u32 %v116_v4, 26 }
  0x68   :  { %v120_v8 = vor.u32 %v119_v7, %v118_v6  ;;  %v122_v10 = vadd.s32 %v117_v5, %v546_v1 }
  0x6a   :  { %v121_v9 = vxor.u32 %v120_v8, %v117_v5 }
  0x6c   :  { %v123_v11 = vadd.s32 %v121_v9, %v546_v1 }
  0x6e   :  { %v124_v12 = vadd.s32 3, %v123_v11 }
  0x70   :  { %v125_v13 = vadd.s32 %v124_v12, %v122_v10  ;;  %v126_v14 = vshll.u32 %v124_v12, 17  ;;  %v127_v15 = vshrl.u32 %v124_v12, 15  ;;  %v236_v10 = vld [vmem:[#allocation7] sm:$0xff] }
  0x72   :  { %v128_v16 = vor.u32 %v127_v15, %v126_v14 }
  0x74   :  { %v129_v17 = vxor.u32 %v128_v16, %v125_v13 }
  0x76   :  { %v130_v18 = vadd.s32 %v129_v17, %v125_v13  ;;  %v131_v19 = vshll.u32 %v129_v17, 29  ;;  %v132_v20 = vshrl.u32 %v129_v17, 3 }
  0x78   :  { %v133_v21 = vor.u32 %v132_v20, %v131_v19 }
  0x7a   :  { %v134_v23 = vxor.u32 %v133_v21, %v130_v18 }
  0x7c   :  { %v135_v24 = vadd.s32 %v134_v23, %v130_v18  ;;  %v136_v25 = vshll.u32 %v134_v23, 16  ;;  %v137_v26 = vshrl.u32 %v134_v23, 16 }
  0x7e   :  { %v138_v27 = vor.u32 %v137_v26, %v136_v25 }
  0x80   :  { %v139_v28 = vxor.u32 %v138_v27, %v135_v24 }
  0x82   :  { %v140_v29 = vadd.s32 %v139_v28, %v135_v24  ;;  %v141_v30 = vshll.u32 %v139_v28, 24  ;;  %v142_v31 = vshrl.u32 %v139_v28, 8 }
  0x84   :  { %v143_v32 = vor.u32 %v142_v31, %v141_v30  ;;  %v145_v34 = vadd.s32 %v140_v29, %v546_v1  ;;  %v495_v31 = vmov -0.00020021426  }
  0x86   :  { %v144_v33 = vxor.u32 %v143_v32, %v140_v29 }
  0x88   :  { %v146_v35 = vadd.s32 %v144_v33, %v552_v22 }
  0x8a   :  { %v147_v36 = vadd.s32 4, %v146_v35 }
  0x8c   :  { %v148_v37 = vadd.s32 %v147_v36, %v145_v34  ;;  %v149_v38 = vshll.u32 %v147_v36, 13  ;;  %v150_v39 = vshrl.u32 %v147_v36, 19  ;;  %v496_v34 = vmov 0.00010095056  }
  0x8e   :  { %v151_v40 = vor.u32 %v150_v39, %v149_v38  ;;  %v497_v39 = vmov 0.0013493432  }
  0x90   :  { %v152_v41 = vxor.u32 %v151_v40, %v148_v37 }
  0x92   :  { %v153_v42 = vadd.s32 %v152_v41, %v148_v37  ;;  %v154_v43 = vshll.u32 %v152_v41, 15  ;;  %v155_v44 = vshrl.u32 %v152_v41, 17 }
  0x94   :  { %v156_v45 = vor.u32 %v155_v44, %v154_v43 }
  0x96   :  { %v157_v46 = vxor.u32 %v156_v45, %v153_v42 }
  0x98   :  { %v158_v47 = vadd.s32 %v157_v46, %v153_v42  ;;  %v159_v48 = vshll.u32 %v157_v46, 26  ;;  %v160_v49 = vshrl.u32 %v157_v46, 6  ;;  %v498_v46 = vmov -0.0036734284  }
  0x9a   :  { %v161_v50 = vor.u32 %v160_v49, %v159_v48 }
  0x9c   :  { %v162_v52 = vxor.u32 %v161_v50, %v158_v47 }
  0x9e   :  { %v163_v53 = vadd.s32 %v162_v52, %v158_v47  ;;  %v164_v54 = vshll.u32 %v162_v52, 6  ;;  %v165_v55 = vshrl.u32 %v162_v52, 26 }
  0xa0   :  { %v166_v56 = vor.u32 %v165_v55, %v164_v54  ;;  %v168_v58 = vadd.s32 %v163_v53, %v552_v22  ;;  %v238_v22 = vand.u32 2147483647, %v236_v10  ;;  %v237_v55 = vmax.f32 %v236_v10, 0.0 }
  0xa2   :  { %v167_v57 = vxor.u32 %v166_v56, %v163_v53  ;;  %v239_v11 = vsub.f32 0.0, %v238_v22  ;;  %v499_v53 = vmov 0.0057395077   ;;  %v503_v22 = vmov 2.8329768  }
  0xa4   :  { %v169_v59 = vadd.s32 %v167_v57, %v546_v1  ;;  %v240_v13 = vmul.f32 1.442695, %v239_v11 }
  0xa6   :  { %v170_v60 = vadd.s32 5, %v169_v59  ;;  %v500_v59 = vmov -0.0076224613  }
  0xa8   :  { %v171_v61 = vxor.u32 %v170_v60, %v168_v58 }
  0xaa   :  { %172 = set.rngseed %v171_v61 }
  0xab   :  { %v173_v62 = vrng }
  0xac   :  { %v174_v63 = vshrl.u32 %v173_v62, 9 }
  0xae   :  { %v175_v2 = vor.u32 1065353216, %v174_v63 }
  0xb0   :  { %v351_v3 = vadd.f32 -1.0, %v175_v2  ;;  %v501_v2 = vmov 0.0094388705  }
  0xb2   :  { %v178_v4 = vmul.f32 2.0, %v351_v3 }
  0xb4   :  { %v179_v5 = vadd.f32 -0.99999994, %v178_v4 }
  0xb6   :  { %v568_v6 = vmax.f32 %v179_v5, -0.99999994 }
  0xb8   :  { %v181_v7 = vsub.f32 0.0, %v568_v6  ;;  %v229_v11 = vand.u32 2147483647, %v568_v6 }
  0xba   :  { %v182_v8 = vmul.f32 %v181_v7, %v568_v6  ;;  %v502_v7 = vmov 1.001674   ;;  %vm230_vm6 = vcmp.eq.f32.partialorder %v229_v11, 1.0 }
  0xbc   :  { %v183_v9 = vadd.f32 1.0, %v182_v8  ;;  %v186_v1 = vmul.f32 -0.5, %v182_v8  ;;  %v189_v14 = vand.u32 2147483647, %v182_v8 }
  0xbe   :  { %374 = vlog2.f32 %v183_v9  ;;  %v187_v12 = vadd.f32 1.0, %v186_v1  ;;  %vm190_vm1 = vcmp.lt.f32.partialorder %v189_v14, 0.0004427343  ;;  %v231_v14 = vmul.f32 inf, %v568_v6 }
  0xbf   :  { %376 = vpow2.f32 %v240_v13 }
  0xc0   :  { %v188_v17 = vmul.f32 %v187_v12, %v182_v8  ;;  %v256_v12 = vshrl.u32 %v51_v0, 7 }
  0xcb   :  { %v375_v15 = vpop.eup %374 }
  0xcc   :  { %v185_v16 = vmul.f32 0.6931472, %v375_v15  ;;  %v377_v20 = vpop.eup %376 }
  0xcd   :  { %v242_v21 = vadd.f32 1.0, %v377_v20  ;;  %v245_v37 = vmul.f32 -0.5, %v377_v20  ;;  %v248_v44 = vand.u32 2147483647, %v377_v20 }
  0xce   :  { %v191_v18 = vsel %vm190_vm1, %v188_v17, %v185_v16  ;;  %v258_v16 = vand.u32 127, %v51_v0  ;;  %v262_v17 = vmul.u32 128, %v256_v12 }
  0xcf   :  { %v192_v19 = vsub.f32 0.0, %v191_v18  ;;  %v246_v42 = vadd.f32 1.0, %v245_v37  ;;  %vm249_vm5 = vcmp.lt.f32.partialorder %v248_v44, 0.0004427343 }
  0xd1   :  { %378 = vrsqrt.f32 %v192_v19  ;;  %vm197_vm2 = vcmp.eq.f32.partialorder %v192_v19, inf  ;;  %v200_v25 = vand.u32 2147483648, %v192_v19  ;;  %vm199_vm3 = vcmp.eq.f32.partialorder %v192_v19, 0.0 }
  0xd2   :  { %380 = vlog2.f32 %v242_v21  ;;  %vm193_vm4 = vcmp.lt.f32.partialorder %v192_v19, 5.0  ;;  %v352_v28 = vadd.f32 -2.5, %v192_v19  ;;  %v247_v50 = vmul.f32 %v377_v20, %v246_v42 }
  0xd3   :  { %v204_v32 = vsel %vm193_vm4, 2.8102264e-08, %v495_v31  ;;  %v205_v35 = vsel %vm193_vm4, 3.4327394e-07, %v496_v34  ;;  %v208_v40 = vsel %vm193_vm4, -3.5233877e-06, %v497_v39 }
  0xd4   :  { %v211_v47 = vsel %vm193_vm4, -4.3915065e-06, %v498_v46  ;;  %v214_v54 = vsel %vm193_vm4, 0.00021858087, %v499_v53  ;;  %v217_v60 = vsel %vm193_vm4, -0.001253725, %v500_v59 }
  0xd5   :  { %v220_v3 = vsel %vm193_vm4, -0.0041776816, %v501_v2  ;;  %v223_v8 = vsel %vm193_vm4, 0.24664073, %v502_v7  ;;  %v226_v1 = vsel %vm193_vm4, 1.5014094, %v503_v22 }
  0xde   :  { %v379_v23 = vpop.eup %378 }
  0xdf   :  { %v196_v24 = vmul.f32 %v379_v23, %v192_v19  ;;  %v381_v43 = vpop.eup %380  ;;  %v235_v23 = vld [vmem:[#allocation4] sm:$0xff] }
  0xe0   :  { %v244_v49 = vmul.f32 0.6931472, %v381_v43 }
  0xe1   :  { %v198_v26 = vsel %vm197_vm2, %v192_v19, %v196_v24  ;;  %v263_v24 = vadd.s32 %v262_v17, %v258_v16 }
  0xe2   :  { %v201_v27 = vsel %vm199_vm3, %v200_v25, %v198_v26  ;;  %v250_v57 = vsel %vm249_vm5, %v247_v50, %v244_v49 }
  0xe3   :  { %v353_v29 = vadd.f32 -3.0, %v201_v27  ;;  %v251_v61 = vadd.f32 %v250_v57, %v237_v55  ;;  %vm264_vm7 = vcmp.lt.s32.totalorder %v263_v24, 296 }
  0xe5   :  { %v203_v30 = vsel %vm193_vm4, %v352_v28, %v353_v29  ;;  %382 = vlog2.f32 %v251_v61 }
  0xe6   :  { %v206_v33 = vmul.f32 %v204_v32, %v203_v30  ;;  %v354_v32 = vsel %vm264_vm7, 1.0, %v494_v51 }
  0xe8   :  { %v207_v36 = vadd.f32 %v206_v33, %v205_v35 }
  0xea   :  { %v209_v38 = vmul.f32 %v207_v36, %v203_v30 }
  0xec   :  { %v210_v41 = vadd.f32 %v209_v38, %v208_v40 }
  0xee   :  { %v212_v45 = vmul.f32 %v210_v41, %v203_v30 }
  0xf0   :  { %v213_v48 = vadd.f32 %v212_v45, %v211_v47 }
  0xf2   :  { %v215_v52 = vmul.f32 %v213_v48, %v203_v30  ;;  %v383_v18 = vpop.eup %382 }
  0xf3   :  { %v268_v19 = vmul.f32 0.6931472, %v383_v18 }
  0xf4   :  { %v216_v56 = vadd.f32 %v215_v52, %v214_v54 }
  0xf6   :  { %v218_v58 = vmul.f32 %v216_v56, %v203_v30 }
  0xf8   :  { %v219_v62 = vadd.f32 %v218_v58, %v217_v60 }
  0xfa   :  { %v221_v63 = vmul.f32 %v219_v62, %v203_v30 }
  0xfc   :  { %v222_v4 = vadd.f32 %v221_v63, %v220_v3 }
  0xfe   :  { %v224_v5 = vmul.f32 %v222_v4, %v203_v30 }
 0x100   :  { %v225_v9 = vadd.f32 %v224_v5, %v223_v8 }
 0x102   :  { %v227_v10 = vmul.f32 %v225_v9, %v203_v30 }
 0x104   :  { %v228_v13 = vadd.f32 %v227_v10, %v226_v1 }
 0x106   :  { %v232_v15 = vmul.f32 %v228_v13, %v568_v6 }
 0x108   :  { %v233_v20 = vsel %vm230_vm6, %v231_v14, %v232_v15 }
 0x109   :  { %v234_v21 = vmul.f32 1.4142135, %v233_v20 }
 0x10b   :  { %v269_v25 = vmul.f32 0.5, %v234_v21  ;;  %v252_v26 = vmul.f32 %v251_v61, %v234_v21 }
 0x10d   :  { %v270_v27 = vmul.f32 %v269_v25, %v234_v21  ;;  %v253_v28 = vadd.f32 %v252_v26, %v235_v23 }
 0x10f   :  { %v271_v29 = vadd.f32 %v270_v27, %v268_v19  ;;  %v275_v30 = vmul.f32 10.0, %v253_v28  ;;  %254 = vst [vmem:[#allocation9] sm:$0xff] %v253_v28 }
 0x111   :  { %v272_v31 = vadd.f32 0.9189385, %v271_v29  ;;  %v276_v6 = vmul.f32 %v275_v30, %v275_v30 }
 0x113   :  { %v273_v0 = vsub.f32 0.0, %v272_v31  ;;  %v277_v33 = vmul.f32 0.5, %v276_v6 }
 0x115   :  { %v280_v34 = vmul.f32 %v354_v32, %v273_v0  ;;  %v278_v35 = vsub.f32 1.3836466, %v277_v33 }
 0x117   :  { %281 = vadd.xlane.f32.xlu0 %v280_v34  ;;  %v295_v36 = vmul.f32 %v354_v32, %v278_v35 }
 0x11b   :  { %296 = vadd.xlane.f32.xlu0 %v295_v36 }
 0x11c   :  { %435 = shalt.err (!%p432_p0)
}
 0x11d   :  { %317 = dma.vmem_to_hbm [thread:$0]  %s315_s1, 128, %s602_s3, [#allocation6]   ;;  %v279_v50 = vld [vmem:[#allocation10] sm:$0x1]  ;;  %v294_v54 = vld [vmem:[#allocation12] sm:$0x1] }
 0x11e   :  { %s505_s7 = smov [#allocation10]   ;;  %s506_s9 = smov [#allocation12]  }
 0x11f   :  { %s324_s8 = sshll.u32 %s505_s7, 4  ;;  %s334_s10 = sshll.u32 %s506_s9, 4  ;;  %s325_s8 = int_to_ptr.vmem [resolvable:$true] %s324_s8  ;;  %s335_s10 = int_to_ptr.vmem [resolvable:$true] %s334_s10 }
 0x120   :  { %s444_s12 = scalar_lea.vmem %s325_s8, 16  ;;  %s448_s13 = scalar_lea.vmem %s325_s8, 32 }
 0x121   :  { %p445_p1 = scmp.ne.s32.totalorder %s325_s8, %s444_s12  ;;  %p449_p2 = scmp.lt.s32.totalorder %s325_s8, %s325_s8 }
 0x122   :  { %p450_p3 = scmp.lt.s32.totalorder %s448_s13, %s444_s12 }
 0x124   :  { %p451_p4 = por %p450_p3, %p449_p2 }
 0x126   :  { %p452_p5 = pnand %p451_p4, %p445_p1 }
 0x1a0   :  { %v282_v51 = vpop.xlane.xlu0 %281 }
 0x1a1   :  { %v283_v37 = vrot.slane %v282_v51, 4 }
 0x1a3   :  { %v284_v38 = vadd.f32 %v283_v37, %v282_v51 }
 0x1a4   :  { %v297_v39 = vpop.xlane.xlu0 %296 }
 0x1a5   :  { %v285_v40 = vrot.slane %v284_v38, 2  ;;  %v298_v41 = vrot.slane %v297_v39, 4 }
 0x1a7   :  { %v299_v42 = vadd.f32 %v298_v41, %v297_v39  ;;  %v286_v43 = vadd.f32 %v285_v40, %v284_v38 }
 0x1a9   :  { %v300_v44 = vrot.slane %v299_v42, 2  ;;  %v287_v45 = vrot.slane %v286_v43, 1 }
 0x1ab   :  { %v301_v46 = vadd.f32 %v300_v44, %v299_v42  ;;  %v288_v47 = vadd.f32 %v287_v45, %v286_v43 }
 0x1ad   :  { %355 = vpush %v288_v47  ;;  %v302_v48 = vrot.slane %v301_v46, 1 }
 0x1af   :  { %v303_v49 = vadd.f32 %v302_v48, %v301_v46 }
 0x1b1   :  { %357 = vpush %v303_v49 }
 0x1de   :  { %s356_s3 = spop %355 }
 0x1df   :  { %v290_v52 = vstv %s356_s3 }
 0x1e0   :  { %v291_v53 = vadd.f32 %v290_v52, %v279_v50 }
 0x1e2   :  { %293 = vst.msk [vmem:[#allocation10] sm:$0x1] %vm46_vm0, %v291_v53  ;;  %s358_s11 = spop %357 }
 0x1e3   :  { %v305_v55 = vstv %s358_s11 }
 0x1e4   :  { %455 = shalt.err (!%p452_p5)
}
 0x1e5   :  { %327 = dma.vmem_to_hbm [thread:$0]  %s325_s8, 16, %s603_s4, [#allocation11]   ;;  %v306_v56 = vadd.f32 %v305_v55, %v294_v54 }
 0x1e6   :  { %s464_s16 = scalar_lea.vmem %s335_s10, 16  ;;  %s468_s17 = scalar_lea.vmem %s335_s10, 32 }
 0x1e7   :  { %307 = vst.msk [vmem:[#allocation12] sm:$0x1] %vm46_vm0, %v306_v56  ;;  %p465_p6 = scmp.ne.s32.totalorder %s335_s10, %s464_s16  ;;  %p469_p7 = scmp.lt.s32.totalorder %s335_s10, %s335_s10 }
 0x1e8   :  { %p470_p8 = scmp.lt.s32.totalorder %s468_s17, %s464_s16 }
 0x1ea   :  { %p471_p9 = por %p470_p8, %p469_p7 }
 0x1ec   :  { %p472_p10 = pnand %p471_p9, %p465_p6 }
 0x1ee   :  { %475 = shalt.err (!%p472_p10)
}
 0x1ef   :  { %337 = dma.vmem_to_hbm [thread:$0]  %s335_s10, 16, %s604_s5, [#allocation11]  }
 0x1f0   :  { %488 = dma.done.wait [#allocation6], 128  }
 0x1f1   :  { %489 = vsyncadd [#allocation6], 4294967168 }
 0x1f2   :  { %490 = dma.done.wait [#allocation11], 32  }
 0x1f3   :  { %491 = vsyncadd [#allocation11], 4294967264 }
 0x1f4   :  { %347 = vsyncpa [#allocation5], 1 }
 0x1f5   :  { %348 = vsyncpa [#allocation8], 1 }
 0x1f6   :  { %349 = vsyncpa [#allocation6], 1 }
 0x1f7   :  { %350 = vsyncpa [#allocation11], 1 }

// kernel: tpu_custom_call.1
= control target key start
LH: loop header
LB: loop body
LE: loop exit
PB: predicated region body
PF: predicated region fallthrough
CT: control target
= control target key end

     0   :  { %11 = vsyncpa [#allocation3], 0  ;;  %s383_s0 = inlined_call_operand.hbm [shape: f32[8,128], index: 0, kind: input, shape index: {}]   ;;  %s384_s1 = inlined_call_operand.hbm [shape: f32[8,128], index: 1, kind: input, shape index: {}]   ;;  %s385_s2 = inlined_call_operand.hbm [shape: f32[8,128], index: 2, kind: input, shape index: {}]   ;;  %s386_s3 = inlined_call_operand.hbm [shape: f32[8,128], index: 3, kind: output, shape index: {0}]   ;;  %s387_s4 = inlined_call_operand.hbm [shape: f32[1,1], index: 4, kind: output, shape index: {1}]   ;;  %s388_s5 = inlined_call_operand.hbm [shape: f32[1,1], index: 5, kind: output, shape index: {2}]  }
   0x1   :  { %12 = vsyncpa [#allocation6], 0 }
   0x2   :  { %13 = vsyncpa [#allocation4], 0 }
   0x3   :  { %14 = vsyncpa [#allocation10], 0  ;;  %s324_s18 = smov [#allocation5]   ;;  %s325_s20 = smov [#allocation2]  }
   0x4   :  { %s31_s19 = sshll.u32 %s324_s18, 4  ;;  %s21_s21 = sshll.u32 %s325_s20, 4  ;;  %s32_s19 = int_to_ptr.vmem [resolvable:$true] %s31_s19  ;;  %s22_s21 = int_to_ptr.vmem [resolvable:$true] %s21_s21 }
   0x5   :  { %s204_s22 = scalar_lea.vmem %s32_s19, 128  ;;  %p209_p1 = scmp.lt.s32.totalorder %s32_s19, %s32_s19 }
   0x6   :  { %p205_p0 = scmp.ne.s32.totalorder %s32_s19, %s204_s22  ;;  %p210_p2 = scmp.lt.s32.totalorder %s204_s22, %s204_s22 }
   0x8   :  { %p211_p3 = por %p210_p2, %p209_p1 }
   0xa   :  { %p212_p4 = pnand %p211_p3, %p205_p0 }
   0xc   :  { %215 = shalt.err (!%p212_p4)
}
   0xd   :  { %34 = dma.hbm_to_vmem [thread:$0]  %s384_s1, 128, %s32_s19, [#allocation6]  }
   0xe   :  { %s224_s25 = scalar_lea.vmem %s22_s21, 128  ;;  %p229_p6 = scmp.lt.s32.totalorder %s22_s21, %s22_s21 }
   0xf   :  { %p225_p5 = scmp.ne.s32.totalorder %s22_s21, %s224_s25  ;;  %p230_p7 = scmp.lt.s32.totalorder %s224_s25, %s224_s25 }
  0x11   :  { %p231_p8 = por %p230_p7, %p229_p6 }
  0x13   :  { %p232_p9 = pnand %p231_p8, %p225_p5 }
  0x15   :  { %235 = shalt.err (!%p232_p9)
}
  0x16   :  { %24 = dma.hbm_to_vmem [thread:$0]  %s383_s0, 128, %s22_s21, [#allocation3]  }
  0x17   :  { %s326_s28 = smov [#allocation7]  }
  0x18   :  { %s41_s29 = sshll.u32 %s326_s28, 4  ;;  %s42_s29 = int_to_ptr.vmem [resolvable:$true] %s41_s29 }
  0x19   :  { %s244_s30 = scalar_lea.vmem %s42_s29, 128  ;;  %p249_p11 = scmp.lt.s32.totalorder %s42_s29, %s42_s29 }
  0x1a   :  { %p245_p10 = scmp.ne.s32.totalorder %s42_s29, %s244_s30  ;;  %p250_p12 = scmp.lt.s32.totalorder %s244_s30, %s244_s30 }
  0x1c   :  { %p251_p13 = por %p250_p12, %p249_p11 }
  0x1e   :  { %p252_p0 = pnand %p251_p13, %p245_p10 }
  0x20   :  { %255 = shalt.err (!%p252_p0)
}
  0x21   :  { %44 = dma.hbm_to_vmem [thread:$0]  %s385_s2, 128, %s42_s29, [#allocation6]  }
  0x22   :  { %316 = dma.done.wait [#allocation3], 128  }
  0x23   :  { %317 = vsyncadd [#allocation3], 4294967168 }
  0x24   :  { %318 = dma.done.wait [#allocation6], 256  }
  0x25   :  { %319 = vsyncadd [#allocation6], 4294967040  ;;  %vm58_vm0 = vcmask 0   ;;  %v327_v0 = vmov 0.0   ;;  %v62_v1 = vld [vmem:[#allocation5] sm:$0xff]  ;;  %v63_v16 = vld [vmem:[#allocation7] sm:$0xff]  ;;  %v82_v18 = vlaneseq }
  0x26   :  { %59 = vst.msk [vmem:[#allocation9] sm:$0x1] %vm58_vm0, %v327_v0  ;;  %60 = vst.msk [vmem:[#allocation11] sm:$0x1] %vm58_vm0, %v327_v0  ;;  %v65_v2 = vand.u32 2147483647, %v62_v1 }
  0x27   :  { %v64_v12 = vmax.f32 %v62_v1, 0.0  ;;  %v61_v17 = vld [vmem:[#allocation2] sm:$0xff]  ;;  %v83_v21 = vshrl.u32 %v82_v18, 7  ;;  %v85_v22 = vand.u32 127, %v82_v18  ;;  %v96_v24 = vmul.f32 0.5, %v63_v16  ;;  %s328_s0 = smov [#allocation8]  }
  0x28   :  { %v66_v3 = vsub.f32 0.0, %v65_v2  ;;  %s141_s2 = sshll.u32 %s328_s0, 4  ;;  %s142_s2 = int_to_ptr.vmem [resolvable:$true] %s141_s2 }
  0x29   :  { %v89_v23 = vmul.u32 128, %v83_v21  ;;  %v97_v27 = vmul.f32 %v96_v24, %v63_v16  ;;  %s256_s7 = scalar_lea.vmem %s142_s2, 128  ;;  %p261_p2 = scmp.lt.s32.totalorder %s142_s2, %s142_s2 }
  0x2a   :  { %v67_v4 = vmul.f32 1.442695, %v66_v3  ;;  %p257_p1 = scmp.ne.s32.totalorder %s142_s2, %s256_s7  ;;  %p262_p3 = scmp.lt.s32.totalorder %s256_s7, %s256_s7 }
  0x2b   :  { %v90_v26 = vadd.s32 %v89_v23, %v85_v22 }
  0x2c   :  { %190 = vpow2.f32 %v67_v4  ;;  %p263_p4 = por %p262_p3, %p261_p2 }
  0x2d   :  { %vm91_vm2 = vcmp.lt.s32.totalorder %v90_v26, 296 }
  0x2e   :  { %v178_v34 = vsel %vm91_vm2, 1.0, %v327_v0  ;;  %p264_p5 = pnand %p263_p4, %p257_p1 }
  0x39   :  { %v191_v5 = vpop.eup %190 }
  0x3a   :  { %v69_v6 = vadd.f32 1.0, %v191_v5  ;;  %v72_v7 = vmul.f32 -0.5, %v191_v5  ;;  %v75_v9 = vand.u32 2147483647, %v191_v5 }
  0x3c   :  { %192 = vlog2.f32 %v69_v6  ;;  %v73_v8 = vadd.f32 1.0, %v72_v7  ;;  %vm76_vm1 = vcmp.lt.f32.partialorder %v75_v9, 0.0004427343 }
  0x3e   :  { %v74_v10 = vmul.f32 %v191_v5, %v73_v8 }
  0x49   :  { %v193_v11 = vpop.eup %192 }
  0x4a   :  { %v71_v13 = vmul.f32 0.6931472, %v193_v11 }
  0x4c   :  { %v77_v14 = vsel %vm76_vm1, %v74_v10, %v71_v13 }
  0x4d   :  { %v78_v15 = vadd.f32 %v77_v14, %v64_v12 }
  0x4f   :  { %194 = vlog2.f32 %v78_v15  ;;  %v79_v19 = vmul.f32 %v78_v15, %v63_v16 }
  0x51   :  { %v80_v20 = vadd.f32 %v79_v19, %v61_v17 }
  0x53   :  { %81 = vst [vmem:[#allocation8] sm:$0xff] %v80_v20  ;;  %v102_v25 = vmul.f32 10.0, %v80_v20 }
  0x55   :  { %v103_v28 = vmul.f32 %v102_v25, %v102_v25 }
  0x57   :  { %v104_v32 = vmul.f32 0.5, %v103_v28 }
  0x59   :  { %v105_v36 = vsub.f32 1.3836466, %v104_v32 }
  0x5b   :  { %v122_v38 = vmul.f32 %v178_v34, %v105_v36 }
  0x5c   :  { %v195_v29 = vpop.eup %194 }
  0x5d   :  { %v95_v30 = vmul.f32 0.6931472, %v195_v29 }
  0x5f   :  { %v98_v31 = vadd.f32 %v97_v27, %v95_v30 }
  0x61   :  { %v99_v33 = vadd.f32 0.9189385, %v98_v31 }
  0x63   :  { %v100_v35 = vsub.f32 0.0, %v99_v33 }
  0x65   :  { %v107_v37 = vmul.f32 %v178_v34, %v100_v35 }
  0x67   :  { %108 = vadd.xlane.f32.xlu0 %v107_v37 }
  0x6b   :  { %123 = vadd.xlane.f32.xlu0 %v122_v38 }
  0x6c   :  { %267 = shalt.err (!%p264_p5)
}
  0x6d   :  { %144 = dma.vmem_to_hbm [thread:$0]  %s142_s2, 128, %s386_s3, [#allocation4]   ;;  %v106_v53 = vld [vmem:[#allocation9] sm:$0x1]  ;;  %v121_v56 = vld [vmem:[#allocation11] sm:$0x1] }
  0x6e   :  { %s329_s10 = smov [#allocation9]   ;;  %s330_s12 = smov [#allocation11]  }
  0x6f   :  { %s151_s11 = sshll.u32 %s329_s10, 4  ;;  %s161_s13 = sshll.u32 %s330_s12, 4  ;;  %s152_s11 = int_to_ptr.vmem [resolvable:$true] %s151_s11  ;;  %s162_s13 = int_to_ptr.vmem [resolvable:$true] %s161_s13 }
  0x70   :  { %s276_s15 = scalar_lea.vmem %s152_s11, 16  ;;  %s280_s16 = scalar_lea.vmem %s152_s11, 32 }
  0x71   :  { %p277_p6 = scmp.ne.s32.totalorder %s152_s11, %s276_s15  ;;  %p281_p7 = scmp.lt.s32.totalorder %s152_s11, %s152_s11 }
  0x72   :  { %p282_p8 = scmp.lt.s32.totalorder %s280_s16, %s276_s15 }
  0x74   :  { %p283_p9 = por %p282_p8, %p281_p7 }
  0x76   :  { %p284_p10 = pnand %p283_p9, %p277_p6 }
  0xf0   :  { %v109_v39 = vpop.xlane.xlu0 %108 }
  0xf1   :  { %v110_v40 = vrot.slane %v109_v39, 4 }
  0xf3   :  { %v111_v41 = vadd.f32 %v110_v40, %v109_v39 }
  0xf4   :  { %v124_v42 = vpop.xlane.xlu0 %123 }
  0xf5   :  { %v112_v43 = vrot.slane %v111_v41, 2  ;;  %v125_v44 = vrot.slane %v124_v42, 4 }
  0xf7   :  { %v126_v45 = vadd.f32 %v125_v44, %v124_v42  ;;  %v113_v46 = vadd.f32 %v112_v43, %v111_v41 }
  0xf9   :  { %v127_v47 = vrot.slane %v126_v45, 2  ;;  %v114_v48 = vrot.slane %v113_v46, 1 }
  0xfb   :  { %v128_v49 = vadd.f32 %v127_v47, %v126_v45  ;;  %v115_v50 = vadd.f32 %v114_v48, %v113_v46 }
  0xfd   :  { %179 = vpush %v115_v50  ;;  %v129_v51 = vrot.slane %v128_v49, 1 }
  0xff   :  { %v130_v52 = vadd.f32 %v129_v51, %v128_v49 }
 0x101   :  { %181 = vpush %v130_v52 }
 0x12e   :  { %s180_s3 = spop %179 }
 0x12f   :  { %v117_v54 = vstv %s180_s3 }
 0x130   :  { %v118_v55 = vadd.f32 %v117_v54, %v106_v53 }
 0x132   :  { %120 = vst.msk [vmem:[#allocation9] sm:$0x1] %vm58_vm0, %v118_v55  ;;  %s182_s14 = spop %181 }
 0x133   :  { %v132_v57 = vstv %s182_s14 }
 0x134   :  { %287 = shalt.err (!%p284_p10)
}
 0x135   :  { %154 = dma.vmem_to_hbm [thread:$0]  %s152_s11, 16, %s387_s4, [#allocation10]   ;;  %v133_v58 = vadd.f32 %v132_v57, %v121_v56 }
 0x136   :  { %s296_s19 = scalar_lea.vmem %s162_s13, 16  ;;  %s300_s20 = scalar_lea.vmem %s162_s13, 32 }
 0x137   :  { %134 = vst.msk [vmem:[#allocation11] sm:$0x1] %vm58_vm0, %v133_v58  ;;  %p297_p11 = scmp.ne.s32.totalorder %s162_s13, %s296_s19  ;;  %p301_p12 = scmp.lt.s32.totalorder %s162_s13, %s162_s13 }
 0x138   :  { %p302_p13 = scmp.lt.s32.totalorder %s300_s20, %s296_s19 }
 0x13a   :  { %p303_p0 = por %p302_p13, %p301_p12 }
 0x13c   :  { %p304_p1 = pnand %p303_p0, %p297_p11 }
 0x13e   :  { %307 = shalt.err (!%p304_p1)
}
 0x13f   :  { %164 = dma.vmem_to_hbm [thread:$0]  %s162_s13, 16, %s388_s5, [#allocation10]  }
 0x140   :  { %320 = dma.done.wait [#allocation4], 128  }
 0x141   :  { %321 = vsyncadd [#allocation4], 4294967168 }
 0x142   :  { %322 = dma.done.wait [#allocation10], 32  }
 0x143   :  { %323 = vsyncadd [#allocation10], 4294967264 }
 0x144   :  { %174 = vsyncpa [#allocation3], 1 }
 0x145   :  { %175 = vsyncpa [#allocation6], 1 }
 0x146   :  { %176 = vsyncpa [#allocation4], 1 }
 0x147   :  { %177 = vsyncpa [#allocation10], 1 }

</bundles_post_ra>
